<compile_context>
chip_gen: v6e
topology: v6e:2x2x1
jax: 0.10.0
libtpu: 0.0.40
codegen_flags: <defaults>
</compile_context>

<pallas_src>
import functools

import jax
import jax.numpy as jnp
from jax.experimental import pallas as pl
from jax.experimental.pallas import tpu as pltpu


def _round_up(x, m):
    return ((x + m - 1) // m) * m


def _encoder_kernel(x_ref, w_ref, b_ref, o_ref, *, mxu_bf16):
    # x_ref: (tm, indim), w_ref: (outdim, indim)  (PyTorch Linear layout),
    # b_ref: (1, outdim), o_ref: (tm, outdim).
    x = x_ref[...]
    w = w_ref[...]
    if mxu_bf16:
        # Cast in VMEM only: HBM stays f32, MXU gets native bf16 operands
        # (avoids v5e's slow f32 multi-pass matmul).  Accumulation is f32.
        x = x.astype(jnp.bfloat16)
        w = w.astype(jnp.bfloat16)
    # Contract x dim 1 with w dim 1  ==  x @ w.T  (MXU transposed-RHS matmul).
    y = jax.lax.dot_general(
        x, w,
        dimension_numbers=(((1,), (1,)), ((), ())),
        preferred_element_type=jnp.float32,
    )
    y = y + b_ref[...]
    o_ref[...] = jnp.maximum(y, 0.0).astype(o_ref.dtype)
    # Dropout: identity (inference).


def esm_msa_feat_encoder(x, weight, bias, *, tm=1024, mxu_bf16=False,
                         out_dtype=None):
    """Fused Linear(indim->outdim) + ReLU (+ inference-mode Dropout).

    x:      (..., indim)
    weight: (outdim, indim)   -- PyTorch Linear convention, fed as-is
    bias:   (outdim,)
    """
    orig_shape = x.shape
    indim = orig_shape[-1]
    outdim, w_indim = weight.shape
    assert w_indim == indim, (weight.shape, indim)
    if out_dtype is None:
        out_dtype = x.dtype

    x2d = x.reshape(-1, indim)          # free reshape, no HBM traffic
    M = x2d.shape[0]

    # --- Tile policy --------------------------------------------------------
    # Balanced tiles (last tile is never mostly dead rows) and at least two
    # grid steps whenever M allows, so both TensorCores on v7x get work.
    tm = _round_up(max(int(tm), 8), 8)
    num_tiles = pl.cdiv(M, tm)
    if num_tiles < 2 and M > 8:
        num_tiles = 2
    tm_eff = _round_up(pl.cdiv(M, num_tiles), 8)
    grid_m = pl.cdiv(M, tm_eff)

    b2d = bias.reshape(1, outdim)

    # --- Explicit VMEM budget (so tm=1024 works on every generation) --------
    x_item = x2d.dtype.itemsize
    w_item = weight.dtype.itemsize
    o_item = jnp.dtype(out_dtype).itemsize
    vmem_needed = (
        2 * tm_eff * indim * x_item       # double-buffered x tiles
        + 2 * tm_eff * outdim * o_item    # double-buffered output tiles
        + 2 * indim * outdim * w_item     # resident W (count x2 to be safe)
        + 2 * 8 * 128 * 4                 # bias (padded tile)
        + (1 << 20)                       # compiler scratch headroom
    )
    # Default tm=1024 f32 needs ~10-14 MiB: fits v5e's 16 MiB scoped default
    # and leaves plenty of headroom under v7x's 64 MiB physical VMEM.
    vmem_limit = int(max(vmem_needed, 16 << 20))

    cost = pl.CostEstimate(
        flops=2 * M * indim * outdim,
        transcendentals=0,
        bytes_accessed=(M * indim * x_item
                        + indim * outdim * w_item
                        + outdim * bias.dtype.itemsize
                        + M * outdim * o_item),
    )

    out = pl.pallas_call(
        functools.partial(_encoder_kernel, mxu_bf16=mxu_bf16),
        out_shape=jax.ShapeDtypeStruct((M, outdim), out_dtype),
        grid_spec=pltpu.PrefetchScalarGridSpec(
            num_scalar_prefetch=0,
            grid=(grid_m,),
            in_specs=[
                # x tile: full contraction axis in one shot; ragged last block
                # handled by Pallas (no wrapper-side jnp.pad round-trip).
                pl.BlockSpec((tm_eff, indim), lambda i: (i, 0)),
                # W in PyTorch (outdim, indim) layout: constant block index ->
                # DMA'd from HBM once, stays resident (512 KiB f32).
                pl.BlockSpec((outdim, indim), lambda i: (0, 0)),
                # bias: constant, resident.
                pl.BlockSpec((1, outdim), lambda i: (0, 0)),
            ],
            out_specs=pl.BlockSpec((tm_eff, outdim), lambda i: (i, 0)),
        ),
        compiler_params=pltpu.CompilerParams(
            # 1-D grid over M is embarrassingly parallel -> shard across TCs.
            dimension_semantics=("parallel",),
            vmem_limit_bytes=vmem_limit,
        ),
        cost_estimate=cost,
    )(x2d, weight, b2d)

    return out.reshape(*orig_shape[:-1], outdim)


if __name__ == "__main__":
    # Module defaults: indim=1024, outdim=128.  seq=9 makes batch*seq = 18
    # (not tile-aligned) to exercise the ragged-boundary path.
    batch, seq, indim, outdim = 2, 9, 1024, 128

    key = jax.random.PRNGKey(0)
    kx, kw, kb = jax.random.split(key, 3)

    x = jax.random.normal(kx, (batch, seq, indim), dtype=jnp.float32)
    # PyTorch Linear parameter convention: weight is (out, in).
    weight = jax.random.normal(kw, (outdim, indim), dtype=jnp.float32) * 0.02
    bias = jax.random.normal(kb, (outdim,), dtype=jnp.float32) * 0.01

    # Plain-JAX reference of the same forward (eval-mode dropout = identity).
    ref = jnp.maximum(x @ weight.T + bias, 0.0)

    # Default path: f32 end to end, matches PyTorch numerics.
    y = jax.block_until_ready(esm_msa_feat_encoder(x, weight, bias))
    assert y.shape == (batch, seq, outdim)
    assert jnp.allclose(y, ref, atol=1e-4, rtol=1e-4)

    # Optional bf16-MXU path (in-kernel cast; HBM traffic stays f32).
    y_bf = jax.block_until_ready(
        esm_msa_feat_encoder(x, weight, bias, mxu_bf16=True))
    assert y_bf.shape == (batch, seq, outdim)
    assert jnp.allclose(y_bf, ref, atol=5e-2, rtol=5e-2)

    print("KERNEL_OK")
</pallas_src>

<mosaic_0001>
module attributes {stable_mosaic.version = 11 : i64} {
  func.func @_encoder_kernel(%arg0: i32, %arg1: memref<16x1024xf32, #tpu.memory_space<vmem>>, %arg2: memref<128x1024xf32, #tpu.memory_space<vmem>>, %arg3: memref<1x128xf32, #tpu.memory_space<vmem>>, %arg4: memref<16x128xf32, #tpu.memory_space<vmem>>) attributes {dimension_semantics = [#tpu.dimension_semantics<parallel>], iteration_bounds = array<i64: 2>, scalar_prefetch = 0 : i64, scratch_operands = 0 : i64, tpu.core_type = #tpu.core_type<tc>, window_params = [{transform_indices = @transform_0, window_bounds = array<i64: 16, 1024>}, {pipeline_mode = #tpu.pipeline_mode<synchronous>, transform_indices = @transform_1, window_bounds = array<i64: 128, 1024>}, {pipeline_mode = #tpu.pipeline_mode<synchronous>, transform_indices = @transform_2, window_bounds = array<i64: 1, 128>}, {transform_indices = @transform_3, window_bounds = array<i64: 16, 128>}]} {
    %c0 = arith.constant 0 : index
    %c0_0 = arith.constant 0 : index
    %0 = vector.load %arg1[%c0, %c0_0] : memref<16x1024xf32, #tpu.memory_space<vmem>>, vector<16x1024xf32>
    %c0_1 = arith.constant 0 : index
    %c0_2 = arith.constant 0 : index
    %1 = vector.load %arg2[%c0_1, %c0_2] : memref<128x1024xf32, #tpu.memory_space<vmem>>, vector<128x1024xf32>
    %cst = arith.constant dense<0.000000e+00> : vector<16x128xf32>
    %2 = tpu.matmul %0, %1, %cst {dimension_numbers = #tpu.dot_dimension_numbers<[1], [1], [0], [0], [0, 0, 1, 0], [], []>} : vector<16x1024xf32>, vector<128x1024xf32>, vector<16x128xf32> -> vector<16x128xf32>
    %c0_3 = arith.constant 0 : index
    %c0_4 = arith.constant 0 : index
    %3 = vector.load %arg3[%c0_3, %c0_4] : memref<1x128xf32, #tpu.memory_space<vmem>>, vector<1x128xf32>
    %4 = vector.broadcast %3 : vector<1x128xf32> to vector<16x128xf32>
    %5 = arith.addf %2, %4 : vector<16x128xf32>
    %cst_5 = arith.constant 0.000000e+00 : f32
    %6 = vector.broadcast %cst_5 : f32 to vector<16x128xf32>
    %7 = arith.maximumf %5, %6 : vector<16x128xf32>
    %c0_6 = arith.constant 0 : index
    %c0_7 = arith.constant 0 : index
    %8 = vector.load %arg4[%c0_6, %c0_7] : memref<16x128xf32, #tpu.memory_space<vmem>>, vector<16x128xf32>
    tpu.vector_store %arg4[%c0_6, %c0_7], %7 {strides = array<i32>} : memref<16x128xf32, #tpu.memory_space<vmem>>, vector<16x128xf32>,
    return
  }
  func.func @transform_0(%arg0: i32) -> (i32, i32) {
    %c0_i32 = arith.constant 0 : i32
    %c0_i32_0 = arith.constant 0 : i32
    return %arg0, %c0_i32 : i32, i32
  }
  func.func @transform_1(%arg0: i32) -> (i32, i32) {
    %c0_i32 = arith.constant 0 : i32
    %c0_i32_0 = arith.constant 0 : i32
    %c0_i32_1 = arith.constant 0 : i32
    return %c0_i32, %c0_i32_0 : i32, i32
  }
  func.func @transform_2(%arg0: i32) -> (i32, i32) {
    %c0_i32 = arith.constant 0 : i32
    %c0_i32_0 = arith.constant 0 : i32
    %c0_i32_1 = arith.constant 0 : i32
    return %c0_i32, %c0_i32_0 : i32, i32
  }
  func.func @transform_3(%arg0: i32) -> (i32, i32) {
    %c0_i32 = arith.constant 0 : i32
    %c0_i32_0 = arith.constant 0 : i32
    return %arg0, %c0_i32 : i32, i32
  }
}

</mosaic_0001>

<bundles_post_ra>
// kernel: tpu_custom_call.1
= control target key start
LH: loop header
LB: loop body
LE: loop exit
PB: predicated region body
PF: predicated region fallthrough
CT: control target
= control target key end

     0   :  { %8 = vsyncpa [#allocation3], 0  ;;  %s1234_s0 = inlined_call_operand.hbm [shape: f32[18,1024], index: 0, kind: input, shape index: {}]   ;;  %s1235_s1 = inlined_call_operand.hbm [shape: f32[128,1024], index: 1, kind: input, shape index: {}]   ;;  %s1236_s2 = inlined_call_operand.vmem [shape: f32[1,128], index: 2, kind: input, shape index: {}]   ;;  %s1237_s3 = inlined_call_operand.hbm [shape: f32[18,128], index: 3, kind: output, shape index: {}]  }
   0x1   :  { %10 = vsyncpa [#allocation3 + $0x1], 0 }
   0x2   :  { %11 = vsyncpa [#allocation6], 0 }
   0x3   :  { %12 = vsyncpa [#allocation4], 0 }
   0x4   :  { %14 = vsyncpa [#allocation4 + $0x1], 0  ;;  %s1019_s12 = smov 0   ;;  %s1021_s13 = smov 0  }
   0x5   :  { %s1023_s14 = smov 0   ;;  %s1025_s15 = smov 0  }
   0x6 LB: > { %s1040_s16 = sadd.s32 4294967295, %s988_s15   ;;  %s781_s17 = sadd.s32 4294967294, %s988_s15   ;;  %s988_s15 = sphi %s1025_s15, %s1252_s15   ;;  %s984_s14 = sphi %s1023_s14, %s1251_s14   ;;  %s980_s13 = sphi %s1021_s13, %s1250_s13   ;;  %s976_s12 = sphi %s1019_s12, %s1249_s12  }
   0x7   : > { %s1044_s18 = sadd.s32 1, %s988_s15   ;;  %s27_s19 = sadd.s32 1, %s984_s14 }
   0x8   : > { %s24_s20 = ssub.s32 %s988_s15, %s1044_s18  ;;  %p34_p0 = scmp.ne.s32.totalorder %s984_s14, %s980_s13 }
   0x9   : > { %p25_p1 = scmp.eq.s32.totalorder %s24_s20, 0  ;;  %p35_p2 = scmp.eq.s32.totalorder %s988_s15, 0 }
   0xa   : > { %p40_p3 = scmp.ne.s32.totalorder %s980_s13, %s976_s12  ;;  %p41_p4 = scmp.eq.s32.totalorder %s1040_s16, 0 }
   0xb   : > { %s1056_s21 = scalar_select %p25_p1, %s984_s14, %s27_s19  }
   0xc   : > { %p1058_p5 = por %p35_p2, %p34_p0  ;;  %p1064_p6 = por %p41_p4, %p40_p3 }
   0xd   : > { %p106_p7 = scmp.eq.s32.totalorder %s1040_s16, 1  ;;  %p112_p8 = scmp.eq.s32.totalorder %s781_s17, 1 }
   0xe   : > { %s1241_s23 = scalar_select %p1064_p6, 1, 0 }
   0xf   : > { %p782_p9 = scmp.ge.s32.totalorder %s988_s15, 1  ;;  %p119_p10 = scmp.lt.s32.totalorder %s988_s15, 3 }
  0x10   : > { %p1071_p11 = por %p106_p7, %p34_p0  ;;  %p1075_p12 = por %p112_p8, %p40_p3 }
  0x11   : > { %p1079_p13 = pnand %p782_p9, %p119_p10  ;;  %s990_s27 = smov [#allocation5]  }
  0x12   : > { %s1242_s24 = scalar_select %p1071_p11, 1, 0 }
  0x13   : > { %s1243_s25 = scalar_select %p1075_p12, 1, 0 }
  0x14   : > { %p818_p1 = pneg %p1079_p13  ;;  %s131_s28 = sshll.u32 %s990_s27, 4  ;;  %s132_s28 = int_to_ptr.vmem [resolvable:$true] %s131_s28 }
  0x15   : > { %s879_s29 = scalar_lea.vmem %s132_s28, 16384  ;;  %p887_p8 = scmp.lt.s32.totalorder %s132_s28, %s132_s28 }
  0x16   : > { %p819_p2 = pnand %p818_p1, %p41_p4  ;;  %p880_p7 = scmp.ne.s32.totalorder %s132_s28, %s879_s29 }
  0x17   : > { %p888_p6 = scmp.lt.s32.totalorder %s879_s29, %s879_s29 }
  0x18   : > { %p870_p0 = pneg %p819_p2 }
  0x19   : > { %p889_p12 = por %p888_p6, %p887_p8 }
  0x1a   : > { %p882_p11 = pnand %p880_p7, %p870_p0 }
  0x1c   : > { %p883_p3 = pneg %p882_p11 }
  0x1e   : > { %p890_p9 = pnand %p889_p12, %p883_p3 }
  0x20   : > { %893 = shalt.err (!%p890_p9)
}
  0x21   : > { %s991_s30 = smov 1024   ;;  %s992_s4 = smov 64  }
  0x22   : > { %821 = dma.hbm_to_vmem [thread:$0]  (!%p819_p2), %s1235_s1, 16384, %s132_s28, [#allocation6], %s991_s30, %s991_s30, %s992_s4  }
  0x23   : > { %p1239_p10 = scmp.ge.s32.totalorder %s988_s15, 2 }
  0x25   : > { %144 = sbr.rel (%p1239_p10) target bundleno = 74 (0x4a), region = 24 }
  0x2a   : > { %147 = sbr.rel (!%p1058_p5) target bundleno = 74 (0x4a), region = 28  ;;  %s148_s7 = sand.u32 (%p1058_p5), 1, %s984_s14  }
  0x2b   : > { %s786_s8 = sshll.u32 (%p1058_p5), %s988_s15, 1  ;;  %s785_s9 = sshll.u32 (%p1058_p5), %s148_s7, 7 }
  0x2c   : > { %s154_s10 = ssub.s32 (%p1058_p5), 3, %s786_s8  ;;  %s1100_s19 = scalar_lea.sflag (%p1058_p5), [#allocation3], %s148_s7 }
  0x2d   : > { %p155_p6 = scmp.lt.s32.totalorder (%p1058_p5), %s154_s10, 2  ;;  %s152_s20 = scalar_lea.vmem (%p1058_p5), [#allocation2], %s785_s9 }
  0x2f   : > { %s1254_s10 = smov (!%p155_p6, %s154_s10), 2 }
  0x30   : > { %s1097_s11 = sshll.u32 %s1254_s10, 10 }
  0x31   : > { %s160_s17 = ssub.s32 2048, %s1097_s11 }
  0x32   : > { %161 = vsyncadd %s1100_s19, %s160_s17  ;;  %p789_p5 = scmp.ne.s32.totalorder %s1097_s11, 0  ;;  %s810_s22 = sshll.u32 %s988_s15, 11 }
  0x33   : > { %s1108_s29 = scalar_lea.hbm %s1234_s0, %s810_s22  ;;  %s167_s30 = sshll.u32 %s152_s20, 4  ;;  %s1110_s30 = int_to_ptr.vmem [resolvable:$true] %s167_s30 }
  0x34   : > { %s894_s4 = scalar_lea.hbm %s1108_s29, %s1097_s11  ;;  %s898_s7 = scalar_lea.hbm %s1234_s0, 3072 }
  0x35   : > { %p895_p11 = scmp.ne.s32.totalorder %s1108_s29, %s894_s4  ;;  %p899_p2 = scmp.lt.s32.totalorder %s1108_s29, %s1234_s0 }
  0x36   : > { %p900_p0 = scmp.lt.s32.totalorder %s898_s7, %s894_s4 }
  0x37   : > { %p896_p12 = pnand %p895_p11, %p789_p5 }
  0x38   : > { %p901_p7 = por %p900_p0, %p899_p2 }
  0x39   : > { %p897_p1 = pneg %p896_p12 }
  0x3b   : > { %p902_p3 = pnand %p901_p7, %p897_p1 }
  0x3d   : > { %905 = shalt.err (!%p902_p3)
}
  0x3e   : > { %s906_s10 = scalar_lea.vmem %s1110_s30, %s1097_s11  ;;  %s993_s17 = smov [#allocation2]  }
  0x3f   : > { %p907_p8 = scmp.ne.s32.totalorder %s1110_s30, %s906_s10  ;;  %s910_s20 = sshll.u32 %s993_s17, 4  ;;  %s911_s20 = int_to_ptr.vmem [resolvable:$false] %s910_s20 }
  0x40   : > { %s912_s22 = scalar_lea.vmem %s911_s20, 4096  ;;  %p913_p11 = scmp.lt.s32.totalorder %s1110_s30, %s911_s20 }
  0x41   : > { %p908_p9 = pnand %p907_p8, %p789_p5  ;;  %p914_p12 = scmp.lt.s32.totalorder %s912_s22, %s906_s10 }
  0x43   : > { %p909_p6 = pneg %p908_p9  ;;  %p915_p10 = por %p914_p12, %p913_p11 }
  0x45   : > { %p916_p2 = pnand %p915_p10, %p909_p6 }
  0x47   : > { %919 = shalt.err (!%p916_p2)
}
  0x48   : > { %s994_s27 = smov 1024   ;;  %s995_s28 = smov 64  }
  0x49   : > { %173 = dma.hbm_to_vmem [thread:$0]  (%p789_p5), %s1108_s29, %s1097_s11, %s1110_s30, %s1100_s19, %s994_s27, %s994_s27, %s995_s28  }
  0x4a PF: > { %179 = sbr.rel (%p1079_p13) target bundleno = 442 (0x1ba), region = 32  ;;  %s1139_s4 = sand.u32 (!%p1079_p13), 1, %s980_s13  }
  0x4b   : > { %s795_s5 = sshll.u32 (!%p1079_p13), %s1139_s4, 7  ;;  %s182_s6 = scalar_lea.sflag (!%p1079_p13), [#allocation3], %s1139_s4 }
  0x4c   : > { %s1143_s7 = scalar_lea.vmem (!%p1079_p13), [#allocation2], %s795_s5  ;;  %p1245_p10 = scmp.ne.s32.totalorder (!%p1079_p13), %s1241_s23, 0 }
  0x4f   : > { %963 = dma.done.wait (%p1245_p10), %s182_s6, 2048  }
  0x50   : > { %965 = vsyncadd (%p1245_p10), %s182_s6, 4294965248 }
  0x51   : > { %967 = dma.done.wait (%p41_p4), [#allocation6], 16384  }
  0x52   : > { %969 = vsyncadd (%p41_p4), [#allocation6], 4294950912  ;;  %v360_v0 = vld [vmem:[#allocation5 + $0x3c8] sm:$0xff]  ;;  %v362_v1 = vld [vmem:[#allocation5 + $0x3d8] sm:$0xff]  ;;  %s797_s11 = sshll.u32 %s1139_s4, 4  ;;  %s679_s29 = scalar_lea.sflag [#allocation4], %s1139_s4 }
  0x53   : > { %v359_v2 = vld [vmem:[#allocation5 + $0x3c0] sm:$0xff]  ;;  %374 = vmatprep.subr.mxu0 %v360_v0  ;;  %449 = vmatprep.subr.mxu1 %v362_v1  ;;  %v361_v3 = vld [vmem:[#allocation5 + $0x3d0] sm:$0xff]  ;;  %v352_v4 = vld [vmem:[#allocation5 + $0x388] sm:$0xff]  ;;  %s211_s19 = scalar_lea.vmem [#allocation7], %s797_s11  ;;  %p1246_p4 = scmp.ne.s32.totalorder %s1242_s24, 0 }
  0x54   : > { %v354_v5 = vld [vmem:[#allocation5 + $0x398] sm:$0xff]  ;;  %375 = vmatpush1.xpose.msra.mxu0 %v359_v2  ;;  %450 = vmatpush1.xpose.msra.mxu1 %v361_v3  ;;  %v351_v6 = vld [vmem:[#allocation5 + $0x380] sm:$0xff]  ;;  %v353_v7 = vld [vmem:[#allocation5 + $0x390] sm:$0xff]  ;;  %s800_s30 = sshll.u32 (%p1246_p4), %s1040_s16, 1 }
  0x55   : > { %376 = vmatprep.subr.mxu0 %v352_v4  ;;  %451 = vmatprep.subr.mxu1 %v354_v5  ;;  %v344_v8 = vld [vmem:[#allocation5 + $0x348] sm:$0xff]  ;;  %v346_v9 = vld [vmem:[#allocation5 + $0x358] sm:$0xff]  ;;  %v343_v10 = vld [vmem:[#allocation5 + $0x340] sm:$0xff]  ;;  %s687_s8 = ssub.s32 (%p1246_p4), 3, %s800_s30 }
  0x56   : > { %v345_v11 = vld [vmem:[#allocation5 + $0x350] sm:$0xff]  ;;  %v336_v12 = vld [vmem:[#allocation5 + $0x308] sm:$0xff]  ;;  %v338_v13 = vld [vmem:[#allocation5 + $0x318] sm:$0xff]  ;;  %p688_p13 = scmp.lt.s32.totalorder (%p1246_p4), %s687_s8, 2 }
  0x57   : > { %v335_v14 = vld [vmem:[#allocation5 + $0x300] sm:$0xff]  ;;  %v337_v15 = vld [vmem:[#allocation5 + $0x310] sm:$0xff]  ;;  %v328_v16 = vld [vmem:[#allocation5 + $0x2c8] sm:$0xff] }
  0x58   : > { %377 = vmatpush1.xpose.msra.mxu0 %v351_v6  ;;  %452 = vmatpush1.xpose.msra.mxu1 %v353_v7  ;;  %v330_v17 = vld [vmem:[#allocation5 + $0x2d8] sm:$0xff]  ;;  %v327_v18 = vld [vmem:[#allocation5 + $0x2c0] sm:$0xff]  ;;  %v329_v19 = vld [vmem:[#allocation5 + $0x2d0] sm:$0xff] }
  0x59   : > { %378 = vmatprep.subr.mxu0 %v344_v8  ;;  %453 = vmatprep.subr.mxu1 %v346_v9  ;;  %v320_v20 = vld [vmem:[#allocation5 + $0x288] sm:$0xff]  ;;  %v322_v21 = vld [vmem:[#allocation5 + $0x298] sm:$0xff]  ;;  %v319_v22 = vld [vmem:[#allocation5 + $0x280] sm:$0xff] }
  0x5a   : > { %v321_v23 = vld [vmem:[#allocation5 + $0x290] sm:$0xff]  ;;  %v312_v24 = vld [vmem:[#allocation5 + $0x248] sm:$0xff]  ;;  %v314_v25 = vld [vmem:[#allocation5 + $0x258] sm:$0xff] }
  0x5b   : > { %v224_v26 = vld [vmem:[%s1143_s7 + $0x8] sm:$0xff]  ;;  %v226_v27 = vld [vmem:[%s1143_s7 + $0x18] sm:$0xff]  ;;  %v311_v28 = vld [vmem:[#allocation5 + $0x240] sm:$0xff] }
  0x5c   : > { %379 = vmatpush1.xpose.msra.mxu0 %v343_v10  ;;  %454 = vmatpush1.xpose.msra.mxu1 %v345_v11  ;;  %v313_v29 = vld [vmem:[#allocation5 + $0x250] sm:$0xff]  ;;  %v304_v30 = vld [vmem:[#allocation5 + $0x208] sm:$0xff]  ;;  %v306_v31 = vld [vmem:[#allocation5 + $0x218] sm:$0xff] }
  0x5d   : > { %380 = vmatprep.subr.mxu0 %v336_v12  ;;  %455 = vmatprep.subr.mxu1 %v338_v13  ;;  %v303_v32 = vld [vmem:[#allocation5 + $0x200] sm:$0xff]  ;;  %v305_v33 = vld [vmem:[#allocation5 + $0x210] sm:$0xff]  ;;  %v296_v34 = vld [vmem:[#allocation5 + $0x1c8] sm:$0xff] }
  0x5e   : > { %438 = vmatprep.mubr.f32.mxu0 %v224_v26  ;;  %513 = vmatprep.mubr.f32.mxu1 %v226_v27  ;;  %v298_v35 = vld [vmem:[#allocation5 + $0x1d8] sm:$0xff]  ;;  %v295_v36 = vld [vmem:[#allocation5 + $0x1c0] sm:$0xff]  ;;  %v297_v37 = vld [vmem:[#allocation5 + $0x1d0] sm:$0xff] }
  0x5f   : > { %v288_v38 = vld [vmem:[#allocation5 + $0x188] sm:$0xff]  ;;  %v290_v39 = vld [vmem:[#allocation5 + $0x198] sm:$0xff]  ;;  %v287_v40 = vld [vmem:[#allocation5 + $0x180] sm:$0xff] }
  0x60   : > { %381 = vmatpush1.xpose.msra.mxu0 %v335_v14  ;;  %456 = vmatpush1.xpose.msra.mxu1 %v337_v15  ;;  %v289_v41 = vld [vmem:[#allocation5 + $0x190] sm:$0xff]  ;;  %v280_v42 = vld [vmem:[#allocation5 + $0x148] sm:$0xff]  ;;  %v282_v43 = vld [vmem:[#allocation5 + $0x158] sm:$0xff] }
  0x61   : > { %382 = vmatprep.subr.mxu0 %v328_v16  ;;  %457 = vmatprep.subr.mxu1 %v330_v17  ;;  %v279_v44 = vld [vmem:[#allocation5 + $0x140] sm:$0xff]  ;;  %v281_v45 = vld [vmem:[#allocation5 + $0x150] sm:$0xff]  ;;  %v272_v46 = vld [vmem:[#allocation5 + $0x108] sm:$0xff] }
  0x62   : > { %v274_v47 = vld [vmem:[#allocation5 + $0x118] sm:$0xff]  ;;  %v271_v48 = vld [vmem:[#allocation5 + $0x100] sm:$0xff]  ;;  %v273_v49 = vld [vmem:[#allocation5 + $0x110] sm:$0xff] }
  0x63   : > { %v264_v50 = vld [vmem:[#allocation5 + $0xc8] sm:$0xff]  ;;  %v266_v51 = vld [vmem:[#allocation5 + $0xd8] sm:$0xff]  ;;  %v263_v52 = vld [vmem:[#allocation5 + $0xc0] sm:$0xff] }
  0x64   : > { %383 = vmatpush1.xpose.msra.mxu0 %v327_v18  ;;  %458 = vmatpush1.xpose.msra.mxu1 %v329_v19  ;;  %v265_v53 = vld [vmem:[#allocation5 + $0xd0] sm:$0xff]  ;;  %v256_v54 = vld [vmem:[#allocation5 + $0x88] sm:$0xff]  ;;  %v258_v55 = vld [vmem:[#allocation5 + $0x98] sm:$0xff] }
  0x65   : > { %384 = vmatprep.subr.mxu0 %v320_v20  ;;  %459 = vmatprep.subr.mxu1 %v322_v21  ;;  %v255_v56 = vld [vmem:[#allocation5 + $0x80] sm:$0xff]  ;;  %v257_v57 = vld [vmem:[#allocation5 + $0x90] sm:$0xff]  ;;  %v248_v58 = vld [vmem:[#allocation5 + $0x48] sm:$0xff] }
  0x66   : > { %v250_v59 = vld [vmem:[#allocation5 + $0x58] sm:$0xff]  ;;  %v247_v60 = vld [vmem:[#allocation5 + $0x40] sm:$0xff]  ;;  %v249_v61 = vld [vmem:[#allocation5 + $0x50] sm:$0xff] }
  0x67   : > { %v240_v62 = vld [vmem:[#allocation5 + $0x8] sm:$0xff]  ;;  %v242_v63 = vld [vmem:[#allocation5 + $0x18] sm:$0xff]  ;;  %v239_v0 = vld [vmem:[#allocation5] sm:$0xff] }
  0x68   : > { %385 = vmatpush1.xpose.msra.mxu0 %v319_v22  ;;  %460 = vmatpush1.xpose.msra.mxu1 %v321_v23  ;;  %v241_v1 = vld [vmem:[#allocation5 + $0x10] sm:$0xff]  ;;  %v364_v2 = vld [vmem:[#allocation5 + $0x3e8] sm:$0xff]  ;;  %v366_v3 = vld [vmem:[#allocation5 + $0x3f8] sm:$0xff] }
  0x69   : > { %386 = vmatprep.subr.mxu0 %v312_v24  ;;  %461 = vmatprep.subr.mxu1 %v314_v25  ;;  %v223_v4 = vld [vmem:[%s1143_s7] sm:$0xff]  ;;  %v225_v5 = vld [vmem:[%s1143_s7 + $0x10] sm:$0xff]  ;;  %v356_v8 = vld [vmem:[#allocation5 + $0x3a8] sm:$0xff] }
  0x6a   : > { %v363_v6 = vld [vmem:[#allocation5 + $0x3e0] sm:$0xff]  ;;  %v365_v7 = vld [vmem:[#allocation5 + $0x3f0] sm:$0xff]  ;;  %v358_v9 = vld [vmem:[#allocation5 + $0x3b8] sm:$0xff] }
  0x6b   : > { %v232_v10 = vld [vmem:[%s1143_s7 + $0x48] sm:$0xff]  ;;  %v234_v11 = vld [vmem:[%s1143_s7 + $0x58] sm:$0xff]  ;;  %v231_v12 = vld [vmem:[%s1143_s7 + $0x40] sm:$0xff] }
  0x6c   : > { %387 = vmatpush1.xpose.msra.mxu0 %v311_v28  ;;  %462 = vmatpush1.xpose.msra.mxu1 %v313_v29  ;;  %v233_v13 = vld [vmem:[%s1143_s7 + $0x50] sm:$0xff]  ;;  %v355_v14 = vld [vmem:[#allocation5 + $0x3a0] sm:$0xff]  ;;  %v348_v16 = vld [vmem:[#allocation5 + $0x368] sm:$0xff] }
  0x6d   : > { %388 = vmatprep.subr.mxu0 %v304_v30  ;;  %463 = vmatprep.subr.mxu1 %v306_v31  ;;  %v357_v15 = vld [vmem:[#allocation5 + $0x3b0] sm:$0xff]  ;;  %v350_v17 = vld [vmem:[#allocation5 + $0x378] sm:$0xff]  ;;  %v228_v18 = vld [vmem:[%s1143_s7 + $0x28] sm:$0xff] }
  0x6e   : > { %v230_v19 = vld [vmem:[%s1143_s7 + $0x38] sm:$0xff]  ;;  %v347_v20 = vld [vmem:[#allocation5 + $0x360] sm:$0xff]  ;;  %v349_v21 = vld [vmem:[#allocation5 + $0x370] sm:$0xff] }
  0x6f   : > { %v340_v22 = vld [vmem:[#allocation5 + $0x328] sm:$0xff]  ;;  %v342_v23 = vld [vmem:[#allocation5 + $0x338] sm:$0xff]  ;;  %v339_v24 = vld [vmem:[#allocation5 + $0x320] sm:$0xff] }
  0x70   : > { %389 = vmatpush1.xpose.msra.mxu0 %v303_v32  ;;  %464 = vmatpush1.xpose.msra.mxu1 %v305_v33  ;;  %v341_v25 = vld [vmem:[#allocation5 + $0x330] sm:$0xff]  ;;  %v332_v26 = vld [vmem:[#allocation5 + $0x2e8] sm:$0xff]  ;;  %v334_v27 = vld [vmem:[#allocation5 + $0x2f8] sm:$0xff] }
  0x71   : > { %390 = vmatprep.subr.mxu0 %v296_v34  ;;  %465 = vmatprep.subr.mxu1 %v298_v35  ;;  %v331_v28 = vld [vmem:[#allocation5 + $0x2e0] sm:$0xff]  ;;  %v333_v29 = vld [vmem:[#allocation5 + $0x2f0] sm:$0xff]  ;;  %v324_v30 = vld [vmem:[#allocation5 + $0x2a8] sm:$0xff] }
  0x72   : > { %v326_v31 = vld [vmem:[#allocation5 + $0x2b8] sm:$0xff]  ;;  %v323_v32 = vld [vmem:[#allocation5 + $0x2a0] sm:$0xff]  ;;  %v325_v33 = vld [vmem:[#allocation5 + $0x2b0] sm:$0xff] }
  0x73   : > { %v316_v34 = vld [vmem:[#allocation5 + $0x268] sm:$0xff]  ;;  %v318_v35 = vld [vmem:[#allocation5 + $0x278] sm:$0xff] }
  0x74   : > { %391 = vmatpush1.xpose.msra.mxu0 %v295_v36  ;;  %466 = vmatpush1.xpose.msra.mxu1 %v297_v37  ;;  %v315_v36 = vld [vmem:[#allocation5 + $0x260] sm:$0xff]  ;;  %v317_v37 = vld [vmem:[#allocation5 + $0x270] sm:$0xff] }
  0x75   : > { %392 = vmatprep.subr.mxu0 %v288_v38  ;;  %467 = vmatprep.subr.mxu1 %v290_v39  ;;  %v308_v38 = vld [vmem:[#allocation5 + $0x228] sm:$0xff]  ;;  %v310_v39 = vld [vmem:[#allocation5 + $0x238] sm:$0xff] }
  0x78   : > { %393 = vmatpush1.xpose.msra.mxu0 %v287_v40  ;;  %468 = vmatpush1.xpose.msra.mxu1 %v289_v41  ;;  %v307_v40 = vld [vmem:[#allocation5 + $0x220] sm:$0xff]  ;;  %v309_v41 = vld [vmem:[#allocation5 + $0x230] sm:$0xff] }
  0x79   : > { %394 = vmatprep.subr.mxu0 %v280_v42  ;;  %469 = vmatprep.subr.mxu1 %v282_v43  ;;  %v300_v42 = vld [vmem:[#allocation5 + $0x1e8] sm:$0xff]  ;;  %v302_v43 = vld [vmem:[#allocation5 + $0x1f8] sm:$0xff] }
  0x7c   : > { %395 = vmatpush1.xpose.msra.mxu0 %v279_v44  ;;  %470 = vmatpush1.xpose.msra.mxu1 %v281_v45  ;;  %v299_v44 = vld [vmem:[#allocation5 + $0x1e0] sm:$0xff]  ;;  %v301_v45 = vld [vmem:[#allocation5 + $0x1f0] sm:$0xff] }
  0x7d   : > { %396 = vmatprep.subr.mxu0 %v272_v46  ;;  %471 = vmatprep.subr.mxu1 %v274_v47  ;;  %v292_v46 = vld [vmem:[#allocation5 + $0x1a8] sm:$0xff]  ;;  %v294_v47 = vld [vmem:[#allocation5 + $0x1b8] sm:$0xff] }
  0x80   : > { %397 = vmatpush1.xpose.msra.mxu0 %v271_v48  ;;  %472 = vmatpush1.xpose.msra.mxu1 %v273_v49  ;;  %v291_v48 = vld [vmem:[#allocation5 + $0x1a0] sm:$0xff]  ;;  %v293_v49 = vld [vmem:[#allocation5 + $0x1b0] sm:$0xff] }
  0x81   : > { %398 = vmatprep.subr.mxu0 %v264_v50  ;;  %473 = vmatprep.subr.mxu1 %v266_v51  ;;  %v284_v50 = vld [vmem:[#allocation5 + $0x168] sm:$0xff]  ;;  %v286_v51 = vld [vmem:[#allocation5 + $0x178] sm:$0xff] }
  0x84   : > { %399 = vmatpush1.xpose.msra.mxu0 %v263_v52  ;;  %474 = vmatpush1.xpose.msra.mxu1 %v265_v53  ;;  %v283_v52 = vld [vmem:[#allocation5 + $0x160] sm:$0xff]  ;;  %v285_v53 = vld [vmem:[#allocation5 + $0x170] sm:$0xff] }
  0x85   : > { %400 = vmatprep.subr.mxu0 %v256_v54  ;;  %475 = vmatprep.subr.mxu1 %v258_v55  ;;  %v276_v54 = vld [vmem:[#allocation5 + $0x128] sm:$0xff]  ;;  %v278_v55 = vld [vmem:[#allocation5 + $0x138] sm:$0xff] }
  0x88   : > { %401 = vmatpush1.xpose.msra.mxu0 %v255_v56  ;;  %476 = vmatpush1.xpose.msra.mxu1 %v257_v57  ;;  %v275_v56 = vld [vmem:[#allocation5 + $0x120] sm:$0xff]  ;;  %v277_v57 = vld [vmem:[#allocation5 + $0x130] sm:$0xff] }
  0x89   : > { %402 = vmatprep.subr.mxu0 %v248_v58  ;;  %477 = vmatprep.subr.mxu1 %v250_v59  ;;  %v268_v58 = vld [vmem:[#allocation5 + $0xe8] sm:$0xff]  ;;  %v270_v59 = vld [vmem:[#allocation5 + $0xf8] sm:$0xff] }
  0x8c   : > { %403 = vmatpush1.xpose.msra.mxu0 %v247_v60  ;;  %478 = vmatpush1.xpose.msra.mxu1 %v249_v61  ;;  %v267_v60 = vld [vmem:[#allocation5 + $0xe0] sm:$0xff]  ;;  %v269_v61 = vld [vmem:[#allocation5 + $0xf0] sm:$0xff] }
  0x8d   : > { %404 = vmatprep.subr.mxu0 %v240_v62  ;;  %479 = vmatprep.subr.mxu1 %v242_v63  ;;  %v260_v62 = vld [vmem:[#allocation5 + $0xa8] sm:$0xff]  ;;  %v262_v63 = vld [vmem:[#allocation5 + $0xb8] sm:$0xff] }
  0x90   : > { %405 = vmatpush1.xpose.msra.mxu0 %v239_v0  ;;  %480 = vmatpush1.xpose.msra.mxu1 %v241_v1  ;;  %v259_v0 = vld [vmem:[#allocation5 + $0xa0] sm:$0xff]  ;;  %v261_v1 = vld [vmem:[#allocation5 + $0xb0] sm:$0xff] }
  0x91   : > { %524 = vmatprep.subr.mxu0 %v364_v2  ;;  %599 = vmatprep.subr.mxu1 %v366_v3  ;;  %v252_v2 = vld [vmem:[#allocation5 + $0x68] sm:$0xff]  ;;  %v254_v3 = vld [vmem:[#allocation5 + $0x78] sm:$0xff] }
  0x93   : > { %439 = vmatmul.mubr.f32.vlgmr.msra.gmra.mxu0 %v223_v4  ;;  %514 = vmatmul.mubr.f32.vlgmr.msra.gmra.mxu1 %v225_v5  ;;  %v251_v4 = vld [vmem:[#allocation5 + $0x60] sm:$0xff]  ;;  %v253_v5 = vld [vmem:[#allocation5 + $0x70] sm:$0xff] }
  0x94   : > { %525 = vmatpush1.xpose.msra.mxu0 %v363_v6  ;;  %600 = vmatpush1.xpose.msra.mxu1 %v365_v7  ;;  %v244_v6 = vld [vmem:[#allocation5 + $0x28] sm:$0xff]  ;;  %v246_v7 = vld [vmem:[#allocation5 + $0x38] sm:$0xff] }
  0x95   : > { %526 = vmatprep.subr.mxu0 %v356_v8  ;;  %601 = vmatprep.subr.mxu1 %v358_v9  ;;  %v243_v8 = vld [vmem:[#allocation5 + $0x20] sm:$0xff]  ;;  %v245_v9 = vld [vmem:[#allocation5 + $0x30] sm:$0xff] }
  0x96   : > { %443 = vmatprep.mubr.f32.mxu0 %v232_v10  ;;  %518 = vmatprep.mubr.f32.mxu1 %v234_v11  ;;  %v227_v10 = vld [vmem:[%s1143_s7 + $0x20] sm:$0xff]  ;;  %v229_v11 = vld [vmem:[%s1143_s7 + $0x30] sm:$0xff] }
  0x97   : > { %444 = vmatmul.mubr.f32.gmra.mxu0 %v231_v12  ;;  %519 = vmatmul.mubr.f32.gmra.mxu1 %v233_v13  ;;  %v236_v12 = vld [vmem:[%s1143_s7 + $0x68] sm:$0xff]  ;;  %v238_v13 = vld [vmem:[%s1143_s7 + $0x78] sm:$0xff] }
  0x98   : > { %527 = vmatpush1.xpose.msra.mxu0 %v355_v14  ;;  %602 = vmatpush1.xpose.msra.mxu1 %v357_v15  ;;  %v235_v14 = vld [vmem:[%s1143_s7 + $0x60] sm:$0xff]  ;;  %v237_v15 = vld [vmem:[%s1143_s7 + $0x70] sm:$0xff] }
  0x99   : > { %528 = vmatprep.subr.mxu0 %v348_v16  ;;  %603 = vmatprep.subr.mxu1 %v350_v17 }
  0x9a   : > { %588 = vmatprep.mubr.f32.mxu0 %v228_v18  ;;  %663 = vmatprep.mubr.f32.mxu1 %v230_v19 }
  0x9c   : > { %529 = vmatpush1.xpose.msra.mxu0 %v347_v20  ;;  %604 = vmatpush1.xpose.msra.mxu1 %v349_v21 }
  0x9d   : > { %530 = vmatprep.subr.mxu0 %v340_v22  ;;  %605 = vmatprep.subr.mxu1 %v342_v23 }
  0xa0   : > { %531 = vmatpush1.xpose.msra.mxu0 %v339_v24  ;;  %606 = vmatpush1.xpose.msra.mxu1 %v341_v25  ;;  %v798_v24 = vld [vmem:[%s1236_s2] ss:$0 sm:$0xff] }
  0xa1   : > { %532 = vmatprep.subr.mxu0 %v332_v26  ;;  %607 = vmatprep.subr.mxu1 %v334_v27 }
  0xa4   : > { %533 = vmatpush1.xpose.msra.mxu0 %v331_v28  ;;  %608 = vmatpush1.xpose.msra.mxu1 %v333_v29 }
  0xa5   : > { %534 = vmatprep.subr.mxu0 %v324_v30  ;;  %609 = vmatprep.subr.mxu1 %v326_v31 }
  0xa8   : > { %535 = vmatpush1.xpose.msra.mxu0 %v323_v32  ;;  %610 = vmatpush1.xpose.msra.mxu1 %v325_v33 }
  0xa9   : > { %536 = vmatprep.subr.mxu0 %v316_v34  ;;  %611 = vmatprep.subr.mxu1 %v318_v35 }
  0xac   : > { %537 = vmatpush1.xpose.msra.mxu0 %v315_v36  ;;  %612 = vmatpush1.xpose.msra.mxu1 %v317_v37 }
  0xad   : > { %538 = vmatprep.subr.mxu0 %v308_v38  ;;  %613 = vmatprep.subr.mxu1 %v310_v39 }
  0xb0   : > { %539 = vmatpush1.xpose.msra.mxu0 %v307_v40  ;;  %614 = vmatpush1.xpose.msra.mxu1 %v309_v41 }
  0xb1   : > { %540 = vmatprep.subr.mxu0 %v300_v42  ;;  %615 = vmatprep.subr.mxu1 %v302_v43 }
  0xb4   : > { %541 = vmatpush1.xpose.msra.mxu0 %v299_v44  ;;  %616 = vmatpush1.xpose.msra.mxu1 %v301_v45 }
  0xb5   : > { %542 = vmatprep.subr.mxu0 %v292_v46  ;;  %617 = vmatprep.subr.mxu1 %v294_v47 }
  0xb8   : > { %543 = vmatpush1.xpose.msra.mxu0 %v291_v48  ;;  %618 = vmatpush1.xpose.msra.mxu1 %v293_v49 }
  0xb9   : > { %544 = vmatprep.subr.mxu0 %v284_v50  ;;  %619 = vmatprep.subr.mxu1 %v286_v51 }
  0xbc   : > { %545 = vmatpush1.xpose.msra.mxu0 %v283_v52  ;;  %620 = vmatpush1.xpose.msra.mxu1 %v285_v53 }
  0xbd   : > { %546 = vmatprep.subr.mxu0 %v276_v54  ;;  %621 = vmatprep.subr.mxu1 %v278_v55 }
  0xc0   : > { %547 = vmatpush1.xpose.msra.mxu0 %v275_v56  ;;  %622 = vmatpush1.xpose.msra.mxu1 %v277_v57 }
  0xc1   : > { %548 = vmatprep.subr.mxu0 %v268_v58  ;;  %623 = vmatprep.subr.mxu1 %v270_v59 }
  0xc4   : > { %549 = vmatpush1.xpose.msra.mxu0 %v267_v60  ;;  %624 = vmatpush1.xpose.msra.mxu1 %v269_v61 }
  0xc5   : > { %550 = vmatprep.subr.mxu0 %v260_v62  ;;  %625 = vmatprep.subr.mxu1 %v262_v63 }
  0xc8   : > { %551 = vmatpush1.xpose.msra.mxu0 %v259_v0  ;;  %626 = vmatpush1.xpose.msra.mxu1 %v261_v1 }
  0xc9   : > { %552 = vmatprep.subr.mxu0 %v252_v2  ;;  %627 = vmatprep.subr.mxu1 %v254_v3 }
  0xcc   : > { %553 = vmatpush1.xpose.msra.mxu0 %v251_v4  ;;  %628 = vmatpush1.xpose.msra.mxu1 %v253_v5 }
  0xcd   : > { %554 = vmatprep.subr.mxu0 %v244_v6  ;;  %629 = vmatprep.subr.mxu1 %v246_v7 }
  0xd0   : > { %555 = vmatpush1.xpose.msra.mxu0 %v243_v8  ;;  %630 = vmatpush1.xpose.msra.mxu1 %v245_v9 }
  0xd3   : > { %589 = vmatmul.mubr.f32.vlgmr.msra.gmra.mxu0 %v227_v10  ;;  %664 = vmatmul.mubr.f32.vlgmr.msra.gmra.mxu1 %v229_v11 }
  0xd4   : > { %593 = vmatprep.mubr.f32.mxu0 %v236_v12  ;;  %668 = vmatprep.mubr.f32.mxu1 %v238_v13 }
  0xd7   : > { %594 = vmatmul.mubr.f32.gmra.mxu0 %v235_v14  ;;  %669 = vmatmul.mubr.f32.gmra.mxu1 %v237_v15 }
 0x153   : > { %v440_v16 = vpop.f32.mrf.mxu0  ;;  %v515_v17 = vpop.f32.mrf.mxu1 }
 0x154   : > { %v441_v25 = vadd.f32 %v798_v24, %v440_v16 }
 0x155   : > { %v442_v18 = vpop.f32.mrf.mxu0  ;;  %v517_v19 = vpop.f32.mrf.mxu1 }
 0x156   : > { %v516_v26 = vadd.f32 %v515_v17, %v441_v25 }
 0x157   : > { %v445_v20 = vpop.f32.mrf.mxu0  ;;  %v520_v21 = vpop.f32.mrf.mxu1 }
 0x158   : > { %v446_v27 = vadd.f32 %v798_v24, %v445_v20 }
 0x159   : > { %v447_v22 = vpop.f32.mrf.mxu0  ;;  %v522_v23 = vpop.f32.mrf.mxu1 }
 0x15a   : > { %v521_v33 = vadd.f32 %v520_v21, %v446_v27 }
 0x193   : > { %v590_v28 = vpop.f32.mrf.mxu0  ;;  %v665_v29 = vpop.f32.mrf.mxu1 }
 0x194   : > { %v591_v30 = vadd.f32 %v590_v28, %v516_v26 }
 0x195   : > { %v592_v31 = vpop.f32.mrf.mxu0  ;;  %v667_v32 = vpop.f32.mrf.mxu1 }
 0x196   : > { %v666_v34 = vadd.f32 %v665_v29, %v591_v30 }
 0x197   : > { %v595_v35 = vpop.f32.mrf.mxu0  ;;  %v670_v36 = vpop.f32.mrf.mxu1 }
 0x198   : > { %v674_v37 = vmax.f32 %v666_v34, 0.0  ;;  %v596_v38 = vadd.f32 %v595_v35, %v521_v33 }
 0x199   : > { %v597_v39 = vpop.f32.mrf.mxu0  ;;  %v672_v40 = vpop.f32.mrf.mxu1 }
 0x19a   : > { %676 = vst [vmem:[%s211_s19] sm:$0xff] %v674_v37  ;;  %v671_v41 = vadd.f32 %v670_v36, %v596_v38  ;;  %685 = sbr.rel (!%p1246_p4) target bundleno = 442 (0x1ba), region = 44 }
 0x19c   : > { %v675_v42 = vmax.f32 %v671_v41, 0.0 }
 0x19e   : > { %677 = vst [vmem:[%s211_s19 + $0x8] sm:$0xff] %v675_v42 }
 0x19f   : > { %s1256_s8 = smov (!%p688_p13, %s687_s8), 2 }
 0x1a0   : > { %s1177_s9 = sshll.u32 %s1256_s8, 7 }
 0x1a1   : > { %s692_s10 = ssub.s32 256, %s1177_s9 }
 0x1a2   : > { %693 = vsyncadd %s679_s29, %s692_s10  ;;  %p802_p5 = scmp.ne.s32.totalorder %s1177_s9, 0  ;;  %s811_s17 = sshll.u32 %s1040_s16, 8 }
 0x1a3   : > { %s1187_s22 = scalar_lea.hbm %s1237_s3, %s811_s17  ;;  %s698_s27 = sshll.u32 %s211_s19, 4  ;;  %s1189_s27 = int_to_ptr.vmem [resolvable:$true] %s698_s27 }
 0x1a4   : > { %s920_s28 = scalar_lea.vmem %s1189_s27, %s1177_s9  ;;  %s996_s5 = smov [#allocation7]  }
 0x1a5   : > { %p921_p1 = scmp.ne.s32.totalorder %s1189_s27, %s920_s28  ;;  %s924_s6 = sshll.u32 %s996_s5, 4  ;;  %s925_s6 = int_to_ptr.vmem [resolvable:$false] %s924_s6 }
 0x1a6   : > { %s926_s16 = scalar_lea.vmem %s925_s6, 512  ;;  %p927_p3 = scmp.lt.s32.totalorder %s1189_s27, %s925_s6 }
 0x1a7   : > { %p922_p0 = pnand %p921_p1, %p802_p5  ;;  %p928_p8 = scmp.lt.s32.totalorder %s926_s16, %s920_s28 }
 0x1a9   : > { %p923_p7 = pneg %p922_p0  ;;  %p929_p9 = por %p928_p8, %p927_p3 }
 0x1ab   : > { %p930_p6 = pnand %p929_p9, %p923_p7 }
 0x1ad   : > { %933 = shalt.err (!%p930_p6)
}
 0x1ae   : > { %s934_s7 = scalar_lea.hbm %s1187_s22, %s1177_s9  ;;  %s938_s11 = scalar_lea.hbm %s1237_s3, 384 }
 0x1af   : > { %p935_p11 = scmp.ne.s32.totalorder %s1187_s22, %s934_s7  ;;  %p939_p10 = scmp.lt.s32.totalorder %s1187_s22, %s1237_s3 }
 0x1b0   : > { %p940_p4 = scmp.lt.s32.totalorder %s938_s11, %s934_s7 }
 0x1b1   : > { %p936_p12 = pnand %p935_p11, %p802_p5 }
 0x1b2   : > { %p941_p13 = por %p940_p4, %p939_p10 }
 0x1b3   : > { %p937_p2 = pneg %p936_p12 }
 0x1b5   : > { %p942_p1 = pnand %p941_p13, %p937_p2 }
 0x1b7   : > { %945 = shalt.err (!%p942_p1)
}
 0x1b8   : > { %s997_s8 = smov 128   ;;  %s998_s10 = smov 8  }
 0x1b9   : > { %704 = dma.vmem_to_hbm [thread:$0]  (%p802_p5), %s1189_s27, %s1177_s9, %s1187_s22, %s679_s29, %s997_s8, %s997_s8, %s998_s10  }
 0x1ba PF: > { %s713_s17 = sand.u32 1, %s976_s12   ;;  %p1247_p0 = scmp.ne.s32.totalorder %s1243_s25, 0 }
 0x1bb   : > { %p1248_p7 = scmp.ge.s32.totalorder %s988_s15, 2  ;;  %s714_s24 = scalar_lea.sflag [#allocation4], %s713_s17 }
 0x1bd   : > { %p823_p3 = pnand %p1248_p7, %p1247_p0 }
 0x1bf   : > { %p824_p8 = pneg %p823_p3 }
 0x1c1   : > { %971 = dma.done.wait (%p824_p8), %s714_s24, 256  }
 0x1c2   : > { %973 = vsyncadd (%p824_p8), %s714_s24, 4294967040  ;;  %p17_p9 = scmp.ge.s32.totalorder %s1044_s18, 4   ;;  %s1249_s12 = smov %s980_s13 }
 0x1c3   : > { %s1250_s13 = smov %s984_s14  ;;  %s1251_s14 = smov %s1056_s21 }
 0x1c4   : > { %s1252_s15 = smov %s1044_s18  ;;  %19 = sbr.rel (!%p17_p9) target bundleno = 6 (0x6), region = 81 }
 0x1c9   :  { %719 = vsyncpa [#allocation3], 1 }
 0x1ca   :  { %721 = vsyncpa [#allocation3 + $0x1], 1 }
 0x1cb   :  { %722 = vsyncpa [#allocation6], 1 }
 0x1cc   :  { %723 = vsyncpa [#allocation4], 1 }
 0x1cd   :  { %725 = vsyncpa [#allocation4 + $0x1], 1 }

</bundles_post_ra>
